<compile_context>
chip_gen: v5e
topology: v5e:2x2
jax: 0.10.0
libtpu: 0.0.40
codegen_flags: <defaults>
</compile_context>

<pallas_src>
import functools

import numpy as np
import jax
import jax.numpy as jnp
from jax.experimental import pallas as pl
from jax.experimental.pallas import tpu as pltpu


def _comp_loss_kernel(y_ref, side_ref, out_ref, *, label_smoothing):
    """Per-token cross-entropy partial sums for the compensation loss.

    y_ref    : (TN, C)      tag logits for TN tokens (native dtype, cast on-chip)
    side_ref : (TN, 1) i32  packed side word: bits 0..15 = target, bit 16 = valid,
                            bit 17 = random keep flag
    out_ref  : (1, 8, 128) f32 accumulator; row 0 lanes 0..3 hold
                            [sum_dec, cnt_dec, sum_tag, cnt_tag]
    """
    @pl.when(pl.program_id(1) == 0)
    def _init():
        out_ref[...] = jnp.zeros_like(out_ref)

    side = side_ref[...]                                   # (TN, 1) i32
    t = side & 0xFFFF                                      # tag target
    valid_b = ((side >> 16) & 1) > 0                       # token participates at all
    keep_b = ((side >> 17) & 1) > 0                        # rand > mask_keep_prob
    vdec = valid_b                                                      # (TN, 1) bool
    vtag = valid_b & ((t != 0) | keep_b)                                # (TN, 1) bool

    # Cast on-chip, unmasked: any OOB-tail garbage stays confined to its own row's
    # per-row scalars (all reductions below are along axis -1) and is where()'d away
    # in the (TN, 1) masked sums at the end.
    y = y_ref[...].astype(jnp.float32)                                  # (TN, C)
    tn, c = y.shape

    # Single shared exp pass over the big tile.
    m_all = jnp.max(y, axis=-1, keepdims=True)
    e = jnp.exp(y - m_all)
    sum_all = jnp.sum(e, axis=-1, keepdims=True)
    # Sum over classes 1..C-1 via subtraction; clamp guards log(0) and f32 cancellation
    # when class 0 carries nearly all of the mass.
    sum_rest = jnp.maximum(sum_all - e[:, 0:1], 1e-37)
    log_sum_all = jnp.log(sum_all)
    lse_all = m_all + log_sum_all

    # Decision logits: d0 = y0, d1 = lse(y[:,1:]) - lse(y) (shared max cancels).
    d0 = y[:, 0:1]
    d1 = jnp.log(sum_rest) - log_sum_all
    is_pos = (t != 0)
    # 2-class CE via stable softplus:  lse(d) - chosen = softplus(other - chosen)
    diff = jnp.where(is_pos, d0 - d1, d1 - d0)             # other - chosen
    softplus = jnp.maximum(diff, 0.0) + jnp.log(1.0 + jnp.exp(-jnp.abs(diff)))

    # Tag CE target logit via one-hot masked sum.
    col = jax.lax.broadcasted_iota(jnp.int32, (tn, c), 1)
    y_t = jnp.sum(jnp.where(col == t, y, 0.0), axis=-1, keepdims=True)

    if label_smoothing:
        # CE(ls) for 2 classes:  softplus(diff) - ls/2 * diff   (exact algebra)
        loss_dec = softplus - 0.5 * label_smoothing * diff
        loss_tag = lse_all - ((1.0 - label_smoothing) * y_t
                              + label_smoothing * jnp.mean(y, axis=-1, keepdims=True))
    else:
        loss_dec = softplus
        loss_tag = lse_all - y_t

    # Validity applied only on (TN,1) scalars; where() blocks NaN/Inf from invalid rows.
    s_dec = jnp.sum(jnp.where(vdec, loss_dec, 0.0), keepdims=True)      # (1, 1)
    c_dec = jnp.sum(jnp.where(vdec, 1.0, 0.0), keepdims=True)
    s_tag = jnp.sum(jnp.where(vtag, loss_tag, 0.0), keepdims=True)
    c_tag = jnp.sum(jnp.where(vtag, 1.0, 0.0), keepdims=True)

    row = jax.lax.broadcasted_iota(jnp.int32, out_ref.shape, 1)
    lane = jax.lax.broadcasted_iota(jnp.int32, out_ref.shape, 2)
    r0 = (row == 0)
    partial = (jnp.where(r0 & (lane == 0), s_dec, 0.0)
               + jnp.where(r0 & (lane == 1), c_dec, 0.0)
               + jnp.where(r0 & (lane == 2), s_tag, 0.0)
               + jnp.where(r0 & (lane == 3), c_tag, 0.0))
    out_ref[...] += partial


def compensation_loss(tag_out, att_mask_out, att_mask_in, tgt, mask, keep_mask,
                      label_smoothing=0.0, tile_n=None, num_cores=1):
    """JAX wrapper reproducing CompensationLoss.forward.

    tag_out      : (B, S, C)      -- out['tag_out'] (any float dtype; cast on-chip)
    att_mask_out : (B, S)         -- out['attention_mask']
    att_mask_in  : (B, S)         -- x['tag_data']['attention_mask']
    tgt          : (B, S) int     -- targets
    mask         : (B,)  bool     -- batch selection mask
    keep_mask    : (B, S) bool    -- precomputed (rand > mask_keep_prob)
    tile_n       : tokens per grid step; None = auto from VMEM capacity and C.
    num_cores    : set to 2 on multi-TensorCore parts to shard the token range.
    """
    B, S, C = tag_out.shape
    assert C < (1 << 16), "tag vocabulary must fit in 16 bits for the packed side word"
    N = B * S
    in_bytes = jnp.dtype(tag_out.dtype).itemsize

    y = tag_out.reshape(N, C)                      # native dtype; no HBM copy / cast

    # ---- pack target + validity + keep flag into one int32 per token -----------
    t_i = tgt.reshape(N).astype(jnp.int32)
    valid = (mask[:, None] & (att_mask_out != 0) & (att_mask_in != 0)).reshape(N)
    # ignore_index-style guard: out-of-range / negative targets never reach the one-hot
    # (the PyTorch reference would raise on such inputs).
    valid = valid & (t_i >= 0) & (t_i < C)
    # TODO(synk): assumes att_mask_out and att_mask_in select the same tokens
    # (GecBertModel guarantees this); a misaligned dynamic-shape gather cannot be
    # expressed in a fixed-shape Pallas kernel.
    keep = keep_mask.reshape(N)
    side = ((t_i & 0xFFFF)
            | (valid.astype(jnp.int32) << 16)
            | (keep.astype(jnp.int32) << 17)).reshape(N, 1)

    # ---- generation-aware tiling & VMEM budget -----------------------------------
    def _ceil(a, b):
        return -(-a // b)

    try:
        vmem_cap = int(pltpu.get_tpu_info().vmem_capacity_bytes)
    except Exception:
        vmem_cap = 64 * 1024 * 1024            # conservative (v7x per-TC size)
    vmem_limit = min(int(vmem_cap * 0.75), 100 * 1024 * 1024)
    budget = int(vmem_cap * 0.5)               # headroom for compiler temps / pipelining
    # Per-row VMEM: double-buffered native-dtype logits, ~5 f32 (TN,C)-sized temporaries
    # (cast, exp, iota / one-hot select), and the 128-lane-padded side word (x2 buffers).
    per_row = 2 * C * in_bytes + 5 * C * 4 + 2 * 128 * 4

    if tile_n is None:
        tile_n = budget // per_row
    tile_n = int(tile_n)
    tile_n = min(tile_n, 2048, _ceil(N, 16) * 16)   # cap also bounds side-buffer padding
    tile_n = max(16, (tile_n // 16) * 16)           # multiple of 16 (bf16 sublane pack)

    num_blocks = _ceil(N, tile_n)
    num_cores = max(1, int(num_cores))
    spc = _ceil(num_blocks, num_cores)             # row-blocks per core
    last_block = num_blocks - 1

    # Pad ONLY the tiny packed side input to the full grid extent (zeros => valid=0);
    # padded / out-of-range rows then contribute nothing inside the kernel.
    np_side = num_cores * spc * tile_n
    if np_side > N:
        side = jnp.pad(side, ((0, np_side - N), (0, 0)))

    kernel = functools.partial(_comp_loss_kernel,
                               label_smoothing=float(label_smoothing))

    cost = pl.CostEstimate(
        flops=int(8 * N * C),
        transcendentals=int(N * C + 4 * N),
        bytes_accessed=int(N * C * in_bytes + 2 * N * 4 + num_cores * 8 * 128 * 4),
    )

    sums = pl.pallas_call(
        kernel,
        out_shape=jax.ShapeDtypeStruct((num_cores, 8, 128), jnp.float32),
        grid_spec=pltpu.PrefetchScalarGridSpec(
            num_scalar_prefetch=0,
            grid=(num_cores, spc),
            in_specs=[
                # Fully-OOB tail blocks clamp to the last valid block; consecutive equal
                # block indices are not re-DMA'd, and their contribution is masked to
                # zero in-kernel via the zero-padded side word.
                pl.BlockSpec((tile_n, C),
                             lambda c, i: (jnp.minimum(c * spc + i, last_block), 0)),
                pl.BlockSpec((tile_n, 1), lambda c, i: (c * spc + i, 0)),
            ],
            out_specs=pl.BlockSpec((1, 8, 128), lambda c, i: (c, 0, 0)),
        ),
        compiler_params=pltpu.CompilerParams(
            dimension_semantics=("parallel", "arbitrary"),
            vmem_limit_bytes=vmem_limit),
        cost_estimate=cost,
    )(y, side)

    totals = jnp.sum(sums, axis=0)                 # (8, 128)
    # Note: mirrors PyTorch — an empty selection yields NaN (division by zero count).
    loss_decision = totals[0, 0] / totals[0, 1]
    loss_tag = totals[0, 2] / totals[0, 3]
    return loss_decision + loss_tag


def _reference_numpy(tag_out, att_out, att_in, tgt, mask, keep_mask):
    """Pure-numpy mirror of the PyTorch forward (label_smoothing=0)."""
    tag_out = np.asarray(tag_out, np.float64)
    att_out = np.asarray(att_out).astype(bool)
    att_in = np.asarray(att_in).astype(bool)
    tgt = np.asarray(tgt)
    mask = np.asarray(mask).astype(bool)
    keep_mask = np.asarray(keep_mask).astype(bool)

    def lse(a, axis=-1):
        m = a.max(axis=axis, keepdims=True)
        return np.squeeze(m + np.log(np.exp(a - m).sum(axis=axis, keepdims=True)), axis)

    def ce(logits, labels):
        l = lse(logits, -1)
        return np.mean(l - logits[np.arange(len(labels)), labels])

    y = tag_out[mask][att_out[mask]]
    t = tgt[mask][att_in[mask]]
    y0 = y[:, 0]
    y1 = lse(y[:, 1:], -1) - lse(y, -1)
    decision = np.stack((y0, y1), -1)
    loss_decision = ce(decision, (t != 0).astype(np.int64))
    kf = keep_mask[mask][att_in[mask]]
    mf = (t != 0) | kf
    loss_tag = ce(y[mf], t[mf])
    return loss_decision + loss_tag


if __name__ == "__main__":
    # --- test 1: small shapes, single block, auto tile_n ---------------------------
    k1, k2, k3, k4 = jax.random.split(jax.random.PRNGKey(0), 4)
    B, S, C = 4, 8, 32
    tag_out = jax.random.normal(k1, (B, S, C), dtype=jnp.float32)
    att_mask = (jax.random.uniform(k2, (B, S)) > 0.3).astype(jnp.int32)
    att_mask = att_mask.at[:, 0].set(1)            # ensure each sequence has tokens
    tgt = jax.random.randint(k3, (B, S), 0, C).astype(jnp.int32)
    mask = jnp.array([True, False, True, True])
    keep_mask = jax.random.uniform(k4, (B, S)) > 0.0        # mask_keep_prob = 0

    loss = compensation_loss(tag_out, att_mask, att_mask, tgt, mask, keep_mask,
                             label_smoothing=0.0)
    loss = jax.block_until_ready(loss)
    ref = _reference_numpy(tag_out, att_mask, att_mask, tgt, mask, keep_mask)
    assert abs(float(loss) - float(ref)) < 1e-4, (float(loss), float(ref))

    # --- test 2: ragged token count, multi-block grid, 2-way "parallel" split ------
    k5, k6, k7, k8 = jax.random.split(jax.random.PRNGKey(1), 4)
    B2, S2 = 3, 173                                 # N = 519 (ragged tail)
    tag_out2 = jax.random.normal(k5, (B2, S2, C), dtype=jnp.float32)
    att2 = (jax.random.uniform(k6, (B2, S2)) > 0.3).astype(jnp.int32)
    att2 = att2.at[:, 0].set(1)
    tgt2 = jax.random.randint(k7, (B2, S2), 0, C).astype(jnp.int32)
    mask2 = jnp.array([True, True, False])
    keep2 = jax.random.uniform(k8, (B2, S2)) > 0.3          # mask_keep_prob = 0.3

    loss2 = compensation_loss(tag_out2, att2, att2, tgt2, mask2, keep2,
                              label_smoothing=0.0, tile_n=128, num_cores=2)
    loss2 = jax.block_until_ready(loss2)
    ref2 = _reference_numpy(tag_out2, att2, att2, tgt2, mask2, keep2)
    assert abs(float(loss2) - float(ref2)) < 1e-3, (float(loss2), float(ref2))

    print("KERNEL_OK")
</pallas_src>

<mosaic_0001>
module attributes {stable_mosaic.version = 11 : i64} {
  func.func @_comp_loss_kernel(%arg0: i32, %arg1: i32, %arg2: memref<32x32xf32, #tpu.memory_space<vmem>>, %arg3: memref<32x1xi32, #tpu.memory_space<vmem>>, %arg4: memref<1x8x128xf32, #tpu.memory_space<vmem>>) attributes {dimension_semantics = [#tpu.dimension_semantics<parallel>, #tpu.dimension_semantics<arbitrary>], iteration_bounds = array<i64: 1, 1>, scalar_prefetch = 0 : i64, scratch_operands = 0 : i64, tpu.core_type = #tpu.core_type<tc>, window_params = [{transform_indices = @transform_0, window_bounds = array<i64: 32, 32>}, {transform_indices = @transform_1, window_bounds = array<i64: 32, 1>}, {transform_indices = @transform_2, window_bounds = array<i64: 1, 8, 128>}]} {
    %c0_i32 = arith.constant 0 : i32
    %0 = arith.cmpi eq, %arg1, %c0_i32 : i32
    %1 = arith.extui %0 : i1 to i32
    %c0_i32_0 = arith.constant 0 : i32
    %2 = arith.cmpi ne, %1, %c0_i32_0 : i32
    scf.if %2 {
      %cst_39 = arith.constant 0.000000e+00 : f32
      %130 = vector.broadcast %cst_39 : f32 to vector<1x8x128xf32>
      %c0_40 = arith.constant 0 : index
      %c0_41 = arith.constant 0 : index
      %c0_42 = arith.constant 0 : index
      %131 = vector.load %arg4[%c0_40, %c0_41, %c0_42] : memref<1x8x128xf32, #tpu.memory_space<vmem>>, vector<1x8x128xf32>
      tpu.vector_store %arg4[%c0_40, %c0_41, %c0_42], %130 {strides = array<i32>} : memref<1x8x128xf32, #tpu.memory_space<vmem>>, vector<1x8x128xf32>,
    } else {
    }
    %c0 = arith.constant 0 : index
    %c0_1 = arith.constant 0 : index
    %3 = vector.load %arg3[%c0, %c0_1] : memref<32x1xi32, #tpu.memory_space<vmem>>, vector<32x1xi32>
    %c65535_i32 = arith.constant 65535 : i32
    %4 = vector.broadcast %c65535_i32 : i32 to vector<32x1xi32>
    %5 = arith.andi %3, %4 : vector<32x1xi32>
    %c16_i32 = arith.constant 16 : i32
    %6 = vector.broadcast %c16_i32 : i32 to vector<32x1xi32>
    %7 = arith.shrsi %3, %6 : vector<32x1xi32>
    %c1_i32 = arith.constant 1 : i32
    %8 = vector.broadcast %c1_i32 : i32 to vector<32x1xi32>
    %9 = arith.andi %7, %8 : vector<32x1xi32>
    %c0_i32_2 = arith.constant 0 : i32
    %10 = vector.broadcast %c0_i32_2 : i32 to vector<32x1xi32>
    %11 = arith.cmpi sgt, %9, %10 : vector<32x1xi32>
    %c17_i32 = arith.constant 17 : i32
    %12 = vector.broadcast %c17_i32 : i32 to vector<32x1xi32>
    %13 = arith.shrsi %3, %12 : vector<32x1xi32>
    %c1_i32_3 = arith.constant 1 : i32
    %14 = vector.broadcast %c1_i32_3 : i32 to vector<32x1xi32>
    %15 = arith.andi %13, %14 : vector<32x1xi32>
    %c0_i32_4 = arith.constant 0 : i32
    %16 = vector.broadcast %c0_i32_4 : i32 to vector<32x1xi32>
    %17 = arith.cmpi sgt, %15, %16 : vector<32x1xi32>
    %c0_i32_5 = arith.constant 0 : i32
    %18 = vector.broadcast %c0_i32_5 : i32 to vector<32x1xi32>
    %19 = arith.cmpi ne, %5, %18 : vector<32x1xi32>
    %20 = arith.ori %19, %17 : vector<32x1xi1>
    %21 = arith.andi %11, %20 : vector<32x1xi1>
    %c0_6 = arith.constant 0 : index
    %c0_7 = arith.constant 0 : index
    %22 = vector.load %arg2[%c0_6, %c0_7] : memref<32x32xf32, #tpu.memory_space<vmem>>, vector<32x32xf32>
    %cst = arith.constant dense<0xFF800000> : vector<32xf32>
    %23 = vector.multi_reduction <maximumf>, %22, %cst [1] : vector<32x32xf32> to vector<32xf32>
    %24 = vector.shape_cast %23 : vector<32xf32> to vector<32x1xf32>
    %25 = vector.broadcast %24 : vector<32x1xf32> to vector<32x32xf32>
    %26 = arith.subf %22, %25 : vector<32x32xf32>
    %27 = math.exp %26 : vector<32x32xf32>
    %cst_8 = arith.constant dense<0.000000e+00> : vector<32xf32>
    %28 = vector.multi_reduction <add>, %27, %cst_8 [1] : vector<32x32xf32> to vector<32xf32>
    %29 = vector.shape_cast %28 : vector<32xf32> to vector<32x1xf32>
    %30 = vector.extract_strided_slice %27 {offsets = [0, 0], sizes = [32, 1], strides = [1, 1]} : vector<32x32xf32> to vector<32x1xf32>
    %31 = arith.subf %29, %30 : vector<32x1xf32>
    %cst_9 = arith.constant 9.99999991E-38 : f32
    %32 = vector.broadcast %cst_9 : f32 to vector<32x1xf32>
    %33 = arith.maximumf %31, %32 : vector<32x1xf32>
    %34 = math.log %29 : vector<32x1xf32>
    %35 = arith.addf %24, %34 : vector<32x1xf32>
    %36 = vector.extract_strided_slice %22 {offsets = [0, 0], sizes = [32, 1], strides = [1, 1]} : vector<32x32xf32> to vector<32x1xf32>
    %37 = math.log %33 : vector<32x1xf32>
    %38 = arith.subf %37, %34 : vector<32x1xf32>
    %c0_i32_10 = arith.constant 0 : i32
    %39 = vector.broadcast %c0_i32_10 : i32 to vector<32x1xi32>
    %40 = arith.cmpi ne, %5, %39 : vector<32x1xi32>
    %41 = arith.subf %36, %38 : vector<32x1xf32>
    %42 = arith.subf %38, %36 : vector<32x1xf32>
    %43 = arith.select %40, %41, %42 : vector<32x1xi1>, vector<32x1xf32>
    %cst_11 = arith.constant 0.000000e+00 : f32
    %44 = vector.broadcast %cst_11 : f32 to vector<32x1xf32>
    %45 = arith.maximumf %43, %44 : vector<32x1xf32>
    %46 = math.absf %43 : vector<32x1xf32>
    %cst_12 = arith.constant 0.000000e+00 : f32
    %47 = vector.broadcast %cst_12 : f32 to vector<32x1xf32>
    %48 = arith.subf %47, %46 : vector<32x1xf32>
    %49 = math.exp %48 : vector<32x1xf32>
    %cst_13 = arith.constant 1.000000e+00 : f32
    %50 = vector.broadcast %cst_13 : f32 to vector<32x1xf32>
    %51 = arith.addf %50, %49 : vector<32x1xf32>
    %52 = math.log %51 : vector<32x1xf32>
    %53 = arith.addf %45, %52 : vector<32x1xf32>
    %54 = tpu.iota {dimensions = array<i32: 1>} : vector<32x32xi32>
    %55 = vector.broadcast %5 : vector<32x1xi32> to vector<32x32xi32>
    %56 = arith.cmpi eq, %54, %55 : vector<32x32xi32>
    %cst_14 = arith.constant 0.000000e+00 : f32
    %57 = vector.broadcast %cst_14 : f32 to vector<32x32xf32>
    %58 = arith.select %56, %22, %57 : vector<32x32xi1>, vector<32x32xf32>
    %cst_15 = arith.constant dense<0.000000e+00> : vector<32xf32>
    %59 = vector.multi_reduction <add>, %58, %cst_15 [1] : vector<32x32xf32> to vector<32xf32>
    %60 = vector.shape_cast %59 : vector<32xf32> to vector<32x1xf32>
    %61 = arith.subf %35, %60 : vector<32x1xf32>
    %cst_16 = arith.constant 0.000000e+00 : f32
    %62 = vector.broadcast %cst_16 : f32 to vector<32x1xf32>
    %63 = arith.select %11, %53, %62 : vector<32x1xi1>, vector<32x1xf32>
    %64 = vector.shape_cast %63 : vector<32x1xf32> to vector<1x32x1xf32>
    %cst_17 = arith.constant dense<0.000000e+00> : vector<1xf32>
    %65 = vector.multi_reduction <add>, %64, %cst_17 [1, 2] : vector<1x32x1xf32> to vector<1xf32>
    %66 = vector.shape_cast %65 : vector<1xf32> to vector<1x1x1xf32>
    %67 = vector.extract %66[0, 0, 0] : f32 from vector<1x1x1xf32>
    %68 = vector.broadcast %67 : f32 to vector<1x1xf32>
    %cst_18 = arith.constant 1.000000e+00 : f32
    %cst_19 = arith.constant 0.000000e+00 : f32
    %69 = vector.broadcast %cst_18 : f32 to vector<32x1xf32>
    %70 = vector.broadcast %cst_19 : f32 to vector<32x1xf32>
    %71 = arith.select %11, %69, %70 : vector<32x1xi1>, vector<32x1xf32>
    %72 = vector.shape_cast %71 : vector<32x1xf32> to vector<1x32x1xf32>
    %cst_20 = arith.constant dense<0.000000e+00> : vector<1xf32>
    %73 = vector.multi_reduction <add>, %72, %cst_20 [1, 2] : vector<1x32x1xf32> to vector<1xf32>
    %74 = vector.shape_cast %73 : vector<1xf32> to vector<1x1x1xf32>
    %75 = vector.extract %74[0, 0, 0] : f32 from vector<1x1x1xf32>
    %76 = vector.broadcast %75 : f32 to vector<1x1xf32>
    %cst_21 = arith.constant 0.000000e+00 : f32
    %77 = vector.broadcast %cst_21 : f32 to vector<32x1xf32>
    %78 = arith.select %21, %61, %77 : vector<32x1xi1>, vector<32x1xf32>
    %79 = vector.shape_cast %78 : vector<32x1xf32> to vector<1x32x1xf32>
    %cst_22 = arith.constant dense<0.000000e+00> : vector<1xf32>
    %80 = vector.multi_reduction <add>, %79, %cst_22 [1, 2] : vector<1x32x1xf32> to vector<1xf32>
    %81 = vector.shape_cast %80 : vector<1xf32> to vector<1x1x1xf32>
    %82 = vector.extract %81[0, 0, 0] : f32 from vector<1x1x1xf32>
    %83 = vector.broadcast %82 : f32 to vector<1x1xf32>
    %cst_23 = arith.constant 1.000000e+00 : f32
    %cst_24 = arith.constant 0.000000e+00 : f32
    %84 = vector.broadcast %cst_23 : f32 to vector<32x1xf32>
    %85 = vector.broadcast %cst_24 : f32 to vector<32x1xf32>
    %86 = arith.select %21, %84, %85 : vector<32x1xi1>, vector<32x1xf32>
    %87 = vector.shape_cast %86 : vector<32x1xf32> to vector<1x32x1xf32>
    %cst_25 = arith.constant dense<0.000000e+00> : vector<1xf32>
    %88 = vector.multi_reduction <add>, %87, %cst_25 [1, 2] : vector<1x32x1xf32> to vector<1xf32>
    %89 = vector.shape_cast %88 : vector<1xf32> to vector<1x1x1xf32>
    %90 = vector.extract %89[0, 0, 0] : f32 from vector<1x1x1xf32>
    %91 = vector.broadcast %90 : f32 to vector<1x1xf32>
    %92 = tpu.iota {dimensions = array<i32: 1>} : vector<1x8x128xi32>
    %93 = tpu.iota {dimensions = array<i32: 2>} : vector<1x8x128xi32>
    %c0_i32_26 = arith.constant 0 : i32
    %94 = vector.broadcast %c0_i32_26 : i32 to vector<1x8x128xi32>
    %95 = arith.cmpi eq, %92, %94 : vector<1x8x128xi32>
    %c0_i32_27 = arith.constant 0 : i32
    %96 = vector.broadcast %c0_i32_27 : i32 to vector<1x8x128xi32>
    %97 = arith.cmpi eq, %93, %96 : vector<1x8x128xi32>
    %98 = arith.andi %95, %97 : vector<1x8x128xi1>
    %cst_28 = arith.constant 0.000000e+00 : f32
    %99 = vector.shape_cast %68 : vector<1x1xf32> to vector<1x1x1xf32>
    %100 = vector.broadcast %99 : vector<1x1x1xf32> to vector<1x8x128xf32>
    %101 = vector.broadcast %cst_28 : f32 to vector<1x8x128xf32>
    %102 = arith.select %98, %100, %101 : vector<1x8x128xi1>, vector<1x8x128xf32>
    %c1_i32_29 = arith.constant 1 : i32
    %103 = vector.broadcast %c1_i32_29 : i32 to vector<1x8x128xi32>
    %104 = arith.cmpi eq, %93, %103 : vector<1x8x128xi32>
    %105 = arith.andi %95, %104 : vector<1x8x128xi1>
    %cst_30 = arith.constant 0.000000e+00 : f32
    %106 = vector.shape_cast %76 : vector<1x1xf32> to vector<1x1x1xf32>
    %107 = vector.broadcast %106 : vector<1x1x1xf32> to vector<1x8x128xf32>
    %108 = vector.broadcast %cst_30 : f32 to vector<1x8x128xf32>
    %109 = arith.select %105, %107, %108 : vector<1x8x128xi1>, vector<1x8x128xf32>
    %110 = arith.addf %102, %109 : vector<1x8x128xf32>
    %c2_i32 = arith.constant 2 : i32
    %111 = vector.broadcast %c2_i32 : i32 to vector<1x8x128xi32>
    %112 = arith.cmpi eq, %93, %111 : vector<1x8x128xi32>
    %113 = arith.andi %95, %112 : vector<1x8x128xi1>
    %cst_31 = arith.constant 0.000000e+00 : f32
    %114 = vector.shape_cast %83 : vector<1x1xf32> to vector<1x1x1xf32>
    %115 = vector.broadcast %114 : vector<1x1x1xf32> to vector<1x8x128xf32>
    %116 = vector.broadcast %cst_31 : f32 to vector<1x8x128xf32>
    %117 = arith.select %113, %115, %116 : vector<1x8x128xi1>, vector<1x8x128xf32>
    %118 = arith.addf %110, %117 : vector<1x8x128xf32>
    %c3_i32 = arith.constant 3 : i32
    %119 = vector.broadcast %c3_i32 : i32 to vector<1x8x128xi32>
    %120 = arith.cmpi eq, %93, %119 : vector<1x8x128xi32>
    %121 = arith.andi %95, %120 : vector<1x8x128xi1>
    %cst_32 = arith.constant 0.000000e+00 : f32
    %122 = vector.shape_cast %91 : vector<1x1xf32> to vector<1x1x1xf32>
    %123 = vector.broadcast %122 : vector<1x1x1xf32> to vector<1x8x128xf32>
    %124 = vector.broadcast %cst_32 : f32 to vector<1x8x128xf32>
    %125 = arith.select %121, %123, %124 : vector<1x8x128xi1>, vector<1x8x128xf32>
    %126 = arith.addf %118, %125 : vector<1x8x128xf32>
    %c0_33 = arith.constant 0 : index
    %c0_34 = arith.constant 0 : index
    %c0_35 = arith.constant 0 : index
    %127 = vector.load %arg4[%c0_33, %c0_34, %c0_35] : memref<1x8x128xf32, #tpu.memory_space<vmem>>, vector<1x8x128xf32>
    %128 = arith.addf %127, %126 : vector<1x8x128xf32>
    %c0_36 = arith.constant 0 : index
    %c0_37 = arith.constant 0 : index
    %c0_38 = arith.constant 0 : index
    %129 = vector.load %arg4[%c0_36, %c0_37, %c0_38] : memref<1x8x128xf32, #tpu.memory_space<vmem>>, vector<1x8x128xf32>
    tpu.vector_store %arg4[%c0_36, %c0_37, %c0_38], %128 {strides = array<i32>} : memref<1x8x128xf32, #tpu.memory_space<vmem>>, vector<1x8x128xf32>,
    return
  }
  func.func @transform_0(%arg0: i32, %arg1: i32) -> (i32, i32) {
    %c1_i32 = arith.constant 1 : i32
    %0 = arith.muli %arg0, %c1_i32 : i32
    %1 = arith.addi %0, %arg1 : i32
    %c0_i32 = arith.constant 0 : i32
    %2 = arith.minsi %1, %c0_i32 : i32
    %c0_i32_0 = arith.constant 0 : i32
    %c0_i32_1 = arith.constant 0 : i32
    return %2, %c0_i32_0 : i32, i32
  }
  func.func @transform_1(%arg0: i32, %arg1: i32) -> (i32, i32) {
    %c1_i32 = arith.constant 1 : i32
    %0 = arith.muli %arg0, %c1_i32 : i32
    %1 = arith.addi %0, %arg1 : i32
    %c0_i32 = arith.constant 0 : i32
    %c0_i32_0 = arith.constant 0 : i32
    return %1, %c0_i32 : i32, i32
  }
  func.func @transform_2(%arg0: i32, %arg1: i32) -> (i32, i32, i32) {
    %c0_i32 = arith.constant 0 : i32
    %c0_i32_0 = arith.constant 0 : i32
    %c0_i32_1 = arith.constant 0 : i32
    return %arg0, %c0_i32, %c0_i32_0 : i32, i32, i32
  }
}

</mosaic_0001>

<bundles_post_ra>
// kernel: tpu_custom_call.1
= control target key start
LH: loop header
LB: loop body
LE: loop exit
PB: predicated region body
PF: predicated region fallthrough
CT: control target
= control target key end

     0   :  { %vm119_vm0 = vcmask 261120   ;;  %v488_v4 = vmov 0   ;;  %s771_s0 = inlined_call_operand.vmem [shape: f32[32,32], index: 0, kind: input, shape index: {}]   ;;  %s772_s1 = inlined_call_operand.vmem [shape: s32[32,1], index: 1, kind: input, shape index: {}]   ;;  %s773_s2 = inlined_call_operand.hbm [shape: f32[1,8,128], index: 2, kind: output, shape index: {}]  }
   0x1   :  { %v509_v0 = vld [vmem:[%s771_s0 + $0x10] sm:$0xff]  ;;  %v514_v1 = vld [vmem:[%s771_s0] sm:$0xff]  ;;  %419 = vset.pattern.permute.xlu1 %v488_v4  ;;  %420 = vset.pattern.permute.xlu2 %v488_v4 }
   0x2   :  { %v126_v2 = vsel %vm119_vm0, %v509_v0, -inf  ;;  %v120_v3 = vsel %vm119_vm0, %v514_v1, -inf }
   0x3   :  { %127 = vmax.xlane.f32.xlu1 %v126_v2  ;;  %121 = vmax.xlane.f32.xlu0 %v120_v3 }
   0x4   :  { %7 = vsyncpa [#allocation3], 0  ;;  %v523_v5 = vld [vmem:[%s772_s1 + $0x8] sm:$0xff]  ;;  %421 = vset.pattern.permute.xlu0 %v488_v4  ;;  %v528_v6 = vld [vmem:[%s771_s0 + $0x18] sm:$0xff]  ;;  %v236_v33 = vlaneseq  ;;  %vm278_vm13 = vcmask 7168   ;;  %s490_s27 = smov [#allocation2]  }
   0x5   :  { %v533_v7 = vld [vmem:[%s771_s0 + $0x8] sm:$0xff]  ;;  %v76_v8 = vand.u32 65535, %v523_v5  ;;  %v129_v9 = vsel %vm119_vm0, %v528_v6, -inf  ;;  %v71_v11 = vld [vmem:[%s772_s1] sm:$0xff]  ;;  %v573_v37 = vld [vmem:[%s772_s1 + $0x10] sm:$0xff]  ;;  %v80_v59 = vshra.s32 %v523_v5, 16 }
   0x6   :  { %v123_v10 = vsel %vm119_vm0, %v533_v7, -inf  ;;  %v75_v12 = vand.u32 65535, %v71_v11  ;;  %v566_v34 = vand.u32 127, %v236_v33  ;;  %v77_v39 = vand.u32 65535, %v573_v37  ;;  %v580_v40 = vld [vmem:[%s772_s1 + $0x18] sm:$0xff]  ;;  %s385_s28 = sshll.u32 %s490_s27, 4  ;;  %s386_s28 = int_to_ptr.vmem [resolvable:$true] %s385_s28 }
   0x7   :  { %242 = vperm.xlu2 %420, %v76_v8   ;;  %v78_v41 = vand.u32 65535, %v580_v40  ;;  %v91_v45 = vshra.s32 %v71_v11, 17  ;;  %v79_v46 = vshra.s32 %v71_v11, 16  ;;  %vm614_vm9 = vcmp.ne.s32.totalorder %v76_v8, 0  ;;  %s387_s3 = sshll.u32 %s773_s2, 4  ;;  %s388_s3 = int_to_ptr.hbm [resolvable:$true] %s387_s3 }
   0x8   :  { %vm588_vm4 = vcmp.ne.s32.totalorder %v75_v12, 0  ;;  %vm608_vm8 = vcmp.ne.s32.totalorder %v77_v39, 0  ;;  %v82_v8 = vshra.s32 %v580_v40, 16 }
   0x9   :  { %v95_v47 = vand.u32 1, %v91_v45  ;;  %v586_v48 = vand.u32 1, %v79_v46  ;;  %vm621_vm11 = vcmp.ne.s32.totalorder %v78_v41, 0 }
   0xb   :  { %130 = vmax.xlane.f32.xlu1 %v129_v9  ;;  %124 = vmax.xlane.f32.xlu0 %v123_v10  ;;  %vm99_vm3 = vcmp.gt.s32.totalorder %v95_v47, 0  ;;  %vm87_vm5 = vcmp.gt.s32.totalorder %v586_v48, 0 }
   0xc   :  { %vm107_vm6 = vmor %vm588_vm4, %vm99_vm3 }
   0xd   :  { %vm597_vm7 = vmand %vm87_vm5, %vm107_vm6 }
  0x24   :  { %239 = vperm.xlu1 %419, %v75_v12   ;;  %v604_v12 = vand.u32 1, %v80_v59 }
  0x26   :  { %vm88_vm10 = vcmp.gt.s32.totalorder %v604_v12, 0 }
  0x61   :  { %v243_v42 = vpop.permute.xlu2 %242 }
  0x62   :  { %vm251_vm2 = vcmp.eq.s32.totalorder %v566_v34, %v243_v42 }
  0x63   :  { %v255_v43 = vsel %vm251_vm2, %v533_v7, 0.0 }
  0x64   :  { %v261_v44 = vsel %vm119_vm0, %v255_v43, 0.0 }
  0x76   :  { %v545_v13 = vpop.xlane.xlu1 %127  ;;  %v547_v14 = vpop.xlane.xlu0 %121 }
  0x77   :  { %v134_v15 = vsub.f32 %v509_v0, %v545_v13  ;;  %v132_v16 = vsub.f32 %v514_v1, %v547_v14 }
  0x79   :  { %v140_v17 = vmul.f32 1.442695, %v134_v15  ;;  %v136_v18 = vmul.f32 1.442695, %v132_v16 }
  0x7b   :  { %422 = vpow2.f32 %v140_v17  ;;  %v81_v17 = vshra.s32 %v573_v37, 16 }
  0x7c   :  { %424 = vpow2.f32 %v136_v18 }
  0x7e   :  { %v553_v19 = vpop.xlane.xlu1 %130  ;;  %v555_v20 = vpop.xlane.xlu0 %124 }
  0x7f   :  { %v135_v21 = vsub.f32 %v528_v6, %v553_v19  ;;  %v133_v22 = vsub.f32 %v533_v7, %v555_v20 }
  0x81   :  { %v423_v23 = vpop.eup %422  ;;  %v142_v24 = vmul.f32 1.442695, %v135_v21  ;;  %v138_v25 = vmul.f32 1.442695, %v133_v22 }
  0x82   :  { %v425_v26 = vpop.eup %424  ;;  %v150_v27 = vsel %vm119_vm0, %v423_v23, 0.0 }
  0x83   :  { %426 = vpow2.f32 %v142_v24  ;;  %151 = vadd.xlane.f32.xlu0 %v150_v27  ;;  %v144_v28 = vsel %vm119_vm0, %v425_v26, 0.0 }
  0x84   :  { %428 = vpow2.f32 %v138_v25  ;;  %145 = vadd.xlane.f32.xlu2 %v144_v28 }
  0x89   :  { %v427_v29 = vpop.eup %426 }
  0x8a   :  { %v429_v30 = vpop.eup %428  ;;  %v153_v31 = vsel %vm119_vm0, %v427_v29, 0.0 }
  0x8b   :  { %154 = vadd.xlane.f32.xlu0 %v153_v31  ;;  %v147_v32 = vsel %vm119_vm0, %v429_v30, 0.0 }
  0x8c   :  { %148 = vadd.xlane.f32.xlu2 %v147_v32  ;;  %v629_v32 = vand.u32 1, %v81_v17 }
  0x8e   :  { %vm89_vm14 = vcmp.gt.s32.totalorder %v629_v32, 0 }
  0x96   :  { %v240_v35 = vpop.permute.xlu1 %239 }
  0x97   :  { %vm250_vm1 = vcmp.eq.s32.totalorder %v566_v34, %v240_v35 }
  0x98   :  { %v254_v36 = vsel %vm250_vm1, %v514_v1, 0.0 }
  0x99   :  { %v258_v38 = vsel %vm119_vm0, %v254_v36, 0.0 }
  0x9a   :  { %259 = vadd.xlane.f32.xlu1 %v258_v38 }
  0x9f   :  { %245 = vperm.xlu0 %421, %v77_v39  }
  0xa4   :  { %248 = vperm.xlu2 %420, %v78_v41  }
  0xcd   :  { %262 = vadd.xlane.f32.xlu2 %v261_v44 }
  0xf6   :  { %v152_v51 = vpop.xlane.xlu0 %151 }
  0xf7   :  { %v158_v52 = vsub.f32 %v152_v51, %v423_v23  ;;  %v146_v53 = vpop.xlane.xlu2 %145  ;;  %430 = vlog2.f32 %v152_v51 }
  0xf8   :  { %v156_v54 = vsub.f32 %v146_v53, %v425_v26  ;;  %432 = vlog2.f32 %v146_v53 }
  0xf9   :  { %v162_v55 = vmax.f32 %v158_v52, 1e-37 }
  0xfa   :  { %v160_v56 = vmax.f32 %v156_v54, 1e-37  ;;  %v649_v54 = vand.u32 1, %v82_v8  ;;  %v92_v8 = vshra.s32 %v523_v5, 17 }
  0xfb   :  { %434 = vlog2.f32 %v162_v55 }
  0xfc   :  { %436 = vlog2.f32 %v160_v56  ;;  %vm90_vm15 = vcmp.gt.s32.totalorder %v649_v54, 0 }
  0xfd   :  { %v431_v58 = vpop.eup %430 }
  0xfe   :  { %v155_v57 = vpop.xlane.xlu0 %154  ;;  %v433_v62 = vpop.eup %432  ;;  %v602_v9 = vmul.f32 0.6931472, %v431_v58  ;;  %v489_v58 = vmov 0.0  }
  0xff   :  { %v159_v60 = vsub.f32 %v155_v57, %v427_v29  ;;  %v149_v61 = vpop.xlane.xlu2 %148  ;;  %438 = vlog2.f32 %v155_v57  ;;  %v165_v15 = vmul.f32 0.6931472, %v433_v62  ;;  %v295_v59 = vsel %vm87_vm5, 1.0, %v489_v58 }
 0x100   :  { %v157_v63 = vsub.f32 %v149_v61, %v429_v30  ;;  %440 = vlog2.f32 %v149_v61 }
 0x101   :  { %v435_v2 = vpop.eup %434  ;;  %v163_v3 = vmax.f32 %v159_v60, 1e-37  ;;  %v172_v49 = vadd.f32 %v165_v15, %v547_v14 }
 0x102   :  { %v437_v4 = vpop.eup %436  ;;  %v181_v10 = vmul.f32 0.6931472, %v435_v2  ;;  %v161_v11 = vmax.f32 %v157_v63, 1e-37 }
 0x103   :  { %v177_v16 = vmul.f32 0.6931472, %v437_v4  ;;  %442 = vlog2.f32 %v163_v3  ;;  %v296_v3 = vsel %vm88_vm10, 1.0, %v489_v58 }
 0x104   :  { %v186_v18 = vsub.f32 %v181_v10, %v602_v9  ;;  %444 = vlog2.f32 %v161_v11 }
 0x105   :  { %v184_v22 = vsub.f32 %v177_v16, %v165_v15  ;;  %v439_v23 = vpop.eup %438  ;;  %v299_v16 = vsel %vm278_vm13, %v295_v59, 0.0 }
 0x106   :  { %v190_v25 = vsub.f32 %v509_v0, %v186_v18  ;;  %v194_v26 = vsub.f32 %v186_v18, %v509_v0  ;;  %v441_v31 = vpop.eup %440  ;;  %v635_v38 = vmul.f32 0.6931472, %v439_v23  ;;  %v298_v18 = vsel %vm90_vm15, 1.0, %v489_v58 }
 0x107   :  { %v188_v28 = vsub.f32 %v514_v1, %v184_v22  ;;  %v192_v29 = vsub.f32 %v184_v22, %v514_v1  ;;  %v249_v30 = vpop.permute.xlu2 %248  ;;  %v645_v46 = vmul.f32 0.6931472, %v441_v31 }
 0x108   :  { %vm253_vm12 = vcmp.eq.s32.totalorder %v566_v34, %v249_v30  ;;  %v633_v35 = vsel %vm608_vm8, %v190_v25, %v194_v26  ;;  %v300_v25 = vsel %vm278_vm13, %v296_v3, 0.0  ;;  %v175_v32 = vadd.f32 %v635_v38, %v553_v19 }
 0x109   :  { %v443_v36 = vpop.eup %442  ;;  %v257_v39 = vsel %vm253_vm12, %v528_v6, 0.0  ;;  %v640_v1 = vsel %vm588_vm4, %v188_v28, %v192_v29  ;;  %v206_v41 = vand.u32 2147483647, %v633_v35  ;;  %v301_v30 = vadd.f32 %v300_v25, %v299_v16 }
 0x10a   :  { %v445_v42 = vpop.eup %444  ;;  %v183_v43 = vmul.f32 0.6931472, %v443_v36  ;;  %v267_v44 = vsel %vm119_vm0, %v257_v39, 0.0  ;;  %v204_v45 = vand.u32 2147483647, %v640_v1  ;;  %v304_v39 = vsel %vm278_vm13, %v298_v18, 0.0 }
 0x10b   :  { %v179_v47 = vmul.f32 0.6931472, %v445_v42  ;;  %268 = vadd.xlane.f32.xlu1 %v267_v44  ;;  %v210_v51 = vsub.f32 0.0, %v206_v41  ;;  %v200_v59 = vmax.f32 %v640_v1, 0.0  ;;  %v173_v12 = vadd.f32 %v645_v46, %v555_v20 }
 0x10c   :  { %v187_v52 = vsub.f32 %v183_v43, %v635_v38  ;;  %v208_v53 = vsub.f32 0.0, %v204_v45  ;;  %vm362_vm12 = vcmp.eq.s32.totalorder %v566_v34, 1 }
 0x10d   :  { %v185_v55 = vsub.f32 %v179_v47, %v645_v46  ;;  %v260_v56 = vpop.xlane.xlu1 %259  ;;  %v216_v57 = vmul.f32 1.442695, %v210_v51  ;;  %v96_v47 = vand.u32 1, %v92_v8 }
 0x10e   :  { %v191_v60 = vsub.f32 %v528_v6, %v187_v52  ;;  %v195_v61 = vsub.f32 %v187_v52, %v528_v6  ;;  %v212_v62 = vmul.f32 1.442695, %v208_v53  ;;  %v270_v14 = vsub.f32 %v172_v49, %v260_v56 }
 0x10f   :  { %v189_v63 = vsub.f32 %v533_v7, %v185_v55  ;;  %v193_v2 = vsub.f32 %v185_v55, %v533_v7  ;;  %446 = vpow2.f32 %v216_v57  ;;  %v297_v6 = vsel %vm89_vm14, 1.0, %v489_v58 }
 0x110   :  { %448 = vpow2.f32 %v212_v62  ;;  %v665_v4 = vsel %vm597_vm7, %v270_v14, 0.0  ;;  %v199_v10 = vsel %vm621_vm11, %v191_v60, %v195_v61  ;;  %v302_v26 = vsel %vm278_vm13, %v297_v6, 0.0 }
 0x111   :  { %v197_v7 = vsel %vm614_vm9, %v189_v63, %v193_v2  ;;  %v246_v11 = vpop.permute.xlu0 %245  ;;  %v207_v15 = vand.u32 2147483647, %v199_v10  ;;  %v303_v43 = vadd.f32 %v302_v26, %v301_v30  ;;  %v94_v61 = vshra.s32 %v580_v40, 17 }
 0x112   :  { %v205_v17 = vand.u32 2147483647, %v197_v7  ;;  %vm252_vm1 = vcmp.eq.s32.totalorder %v566_v34, %v246_v11  ;;  %v202_v14 = vmax.f32 %v633_v35, 0.0  ;;  %v201_v6 = vmax.f32 %v197_v7, 0.0 }
 0x113   :  { %v256_v22 = vsel %vm252_vm1, %v509_v0, 0.0  ;;  %v211_v23 = vsub.f32 0.0, %v207_v15  ;;  %v305_v45 = vadd.f32 %v304_v39, %v303_v43  ;;  %v98_v3 = vand.u32 1, %v94_v61 }
 0x114   :  { %v209_v28 = vsub.f32 0.0, %v205_v17  ;;  %v264_v29 = vsel %vm119_vm0, %v256_v22, 0.0  ;;  %vm100_vm0 = vcmp.gt.s32.totalorder %v96_v47, 0  ;;  %v203_v11 = vmax.f32 %v199_v10, 0.0 }
 0x115   :  { %v447_v31 = vpop.eup %446  ;;  %265 = vadd.xlane.f32.xlu0 %v264_v29  ;;  %v218_v36 = vmul.f32 1.442695, %v211_v23  ;;  %306 = vadd.xlane.f32.xlu1 %v305_v45  ;;  %vm108_vm2 = vmor %vm614_vm9, %vm100_vm0  ;;  %vm102_vm4 = vcmp.gt.s32.totalorder %v98_v3, 0  ;;  %v319_v54 = vsel %vm278_vm13, %v665_v4, 0.0  ;;  %v93_v39 = vshra.s32 %v573_v37, 17 }
 0x116   :  { %v449_v41 = vpop.eup %448  ;;  %v214_v42 = vmul.f32 1.442695, %v209_v28  ;;  %v222_v44 = vadd.f32 1.0, %v447_v31  ;;  %vm690_vm3 = vmand %vm88_vm10, %vm108_vm2  ;;  %vm372_vm1 = vcmp.eq.s32.totalorder %v566_v34, 3 }
 0x117   :  { %v220_v0 = vadd.f32 1.0, %v449_v41  ;;  %450 = vpow2.f32 %v218_v36  ;;  %vm110_vm6 = vmor %vm621_vm11, %vm102_vm4  ;;  %v97_v41 = vand.u32 1, %v93_v39  ;;  %v336_v20 = vsel %vm690_vm3, 1.0, %v489_v58 }
 0x118   :  { %452 = vpow2.f32 %v214_v42  ;;  %vm703_vm9 = vmand %vm90_vm15, %vm110_vm6  ;;  %v335_v42 = vsel %vm597_vm7, 1.0, %v489_v58  ;;  %v340_v43 = vsel %vm278_vm13, %v336_v20, 0.0 }
 0x119   :  { %454 = vlog2.f32 %v220_v0  ;;  %v339_v46 = vsel %vm278_vm13, %v335_v42, 0.0 }
 0x11a   :  { %456 = vlog2.f32 %v222_v44  ;;  %v341_v4 = vadd.f32 %v340_v43, %v339_v46  ;;  %v338_v44 = vsel %vm703_vm9, 1.0, %v489_v58 }
 0x11b   :  { %v344_v21 = vsel %vm278_vm13, %v338_v44, 0.0 }
 0x11d   :  { %v451_v51 = vpop.eup %450 }
 0x11e   :  { %v453_v52 = vpop.eup %452  ;;  %v223_v5 = vadd.f32 1.0, %v451_v51 }
 0x11f   :  { %v455_v49 = vpop.eup %454  ;;  %v221_v53 = vadd.f32 1.0, %v453_v52 }
 0x120   :  { %458 = vlog2.f32 %v223_v5  ;;  %v457_v55 = vpop.eup %456  ;;  %v225_v57 = vmul.f32 0.6931472, %v455_v49  ;;  %v174_v49 = vadd.f32 %v602_v9, %v545_v13 }
 0x121   :  { %460 = vlog2.f32 %v221_v53  ;;  %v229_v60 = vmul.f32 0.6931472, %v457_v55 }
 0x122   :  { %v232_v63 = vadd.f32 %v225_v57, %v200_v59 }
 0x123   :  { %v234_v16 = vadd.f32 %v229_v60, %v202_v14 }
 0x124   :  { %v274_v1 = vsel %vm87_vm5, %v232_v63, 0.0  ;;  %vm101_vm5 = vcmp.gt.s32.totalorder %v97_v41, 0 }
 0x125   :  { %v276_v10 = vsel %vm89_vm14, %v234_v16, 0.0  ;;  %v279_v7 = vsel %vm278_vm13, %v274_v1, 0.0 }
 0x126   :  { %v459_v62 = vpop.eup %458  ;;  %v282_v23 = vsel %vm278_vm13, %v276_v10, 0.0 }
 0x127   :  { %v461_v24 = vpop.eup %460  ;;  %v231_v2 = vmul.f32 0.6931472, %v459_v62 }
 0x128   :  { %v227_v15 = vmul.f32 0.6931472, %v461_v24 }
 0x129   :  { %v235_v18 = vadd.f32 %v231_v2, %v203_v11 }
 0x12a   :  { %v233_v17 = vadd.f32 %v227_v15, %v201_v6 }
 0x12b   :  { %v277_v27 = vsel %vm90_vm15, %v235_v18, 0.0  ;;  %vm367_vm15 = vcmp.eq.s32.totalorder %v566_v34, 2 }
 0x12c   :  { %v275_v35 = vsel %vm88_vm10, %v233_v17, 0.0  ;;  %v284_v26 = vsel %vm278_vm13, %v277_v27, 0.0  ;;  %vm109_vm10 = vmor %vm608_vm8, %vm101_vm5  ;;  %vm358_vm8 = vcmp.eq.s32.totalorder %v566_v34, 0 }
 0x12d   :  { %v280_v48 = vsel %vm278_vm13, %v275_v35, 0.0  ;;  %vm737_vm11 = vmand %vm89_vm14, %vm109_vm10 }
 0x12e   :  { %v281_v22 = vadd.f32 %v280_v48, %v279_v7  ;;  %v337_v50 = vsel %vm737_vm11, 1.0, %v489_v58 }
 0x12f   :  { %v342_v0 = vsel %vm278_vm13, %v337_v50, 0.0 }
 0x130   :  { %v283_v25 = vadd.f32 %v282_v23, %v281_v22  ;;  %v343_v45 = vadd.f32 %v342_v0, %v341_v4 }
 0x132   :  { %v285_v28 = vadd.f32 %v284_v26, %v283_v25  ;;  %v345_v47 = vadd.f32 %v344_v21, %v343_v45 }
 0x134   :  { %286 = vadd.xlane.f32.xlu2 %v285_v28  ;;  %346 = vadd.xlane.f32.xlu1 %v345_v47  ;;  %v356_v28 = vshrl.u32 %v236_v33, 7 }
 0x136   :  { %vm357_vm7 = vcmp.eq.s32.totalorder %v356_v28, 0 }
 0x137   :  { %vm363_vm14 = vmand %vm357_vm7, %vm362_vm12 }
 0x138   :  { %vm368_vm0 = vmand %vm357_vm7, %vm367_vm15 }
 0x139   :  { %vm373_vm2 = vmand %vm357_vm7, %vm372_vm1 }
 0x140   :  { %v263_v29 = vpop.xlane.xlu2 %262 }
 0x141   :  { %v271_v30 = vsub.f32 %v173_v12, %v263_v29 }
 0x143   :  { %v316_v31 = vsel %vm690_vm3, %v271_v30, 0.0 }
 0x144   :  { %v320_v8 = vsel %vm278_vm13, %v316_v31, 0.0 }
 0x145   :  { %v321_v36 = vadd.f32 %v320_v8, %v319_v54 }
 0x17e   :  { %v269_v51 = vpop.xlane.xlu1 %268 }
 0x17f   :  { %v273_v52 = vsub.f32 %v175_v32, %v269_v51 }
 0x181   :  { %v318_v5 = vsel %vm703_vm9, %v273_v52, 0.0 }
 0x182   :  { %v324_v59 = vsel %vm278_vm13, %v318_v5, 0.0 }
 0x188   :  { %v266_v53 = vpop.xlane.xlu0 %265  ;;  %v307_v19 = vpop.xlane.xlu1 %306 }
 0x189   :  { %v272_v55 = vsub.f32 %v174_v49, %v266_v53  ;;  %v308_v38 = vrot.slane %v307_v19, 4 }
 0x18b   :  { %v317_v58 = vsel %vm737_vm11, %v272_v55, 0.0  ;;  %v309_v61 = vadd.f32 %v308_v38, %v307_v19 }
 0x18c   :  { %v322_v56 = vsel %vm278_vm13, %v317_v58, 0.0  ;;  %vm359_vm13 = vmand %vm357_vm7, %vm358_vm8 }
 0x18d   :  { %v323_v57 = vadd.f32 %v322_v56, %v321_v36  ;;  %v310_v62 = vrot.slane %v309_v61, 2 }
 0x18f   :  { %v325_v60 = vadd.f32 %v324_v59, %v323_v57  ;;  %v311_v24 = vadd.f32 %v310_v62, %v309_v61 }
 0x191   :  { %326 = vadd.xlane.f32.xlu2 %v325_v60  ;;  %v312_v2 = vrot.slane %v311_v24, 1 }
 0x193   :  { %v313_v11 = vadd.f32 %v312_v2, %v311_v24 }
 0x1a7   :  { %v287_v14 = vpop.xlane.xlu2 %286  ;;  %v347_v16 = vpop.xlane.xlu1 %346 }
 0x1a8   :  { %v288_v63 = vrot.slane %v287_v14, 4  ;;  %v348_v17 = vrot.slane %v347_v16, 4 }
 0x1aa   :  { %v289_v13 = vadd.f32 %v288_v63, %v287_v14  ;;  %v349_v18 = vadd.f32 %v348_v17, %v347_v16 }
 0x1ac   :  { %v290_v9 = vrot.slane %v289_v13, 2  ;;  %v350_v1 = vrot.slane %v349_v18, 2 }
 0x1ae   :  { %v291_v3 = vadd.f32 %v290_v9, %v289_v13  ;;  %v351_v7 = vadd.f32 %v350_v1, %v349_v18 }
 0x1b0   :  { %v292_v6 = vrot.slane %v291_v3, 1  ;;  %v352_v22 = vrot.slane %v351_v7, 1 }
 0x1b2   :  { %v293_v15 = vadd.f32 %v292_v6, %v291_v3  ;;  %v353_v26 = vadd.f32 %v352_v22, %v351_v7 }
 0x1b4   :  { %408 = vpush %v293_v15 }
 0x1b5   :  { %410 = vpush %v313_v11 }
 0x1e5   :  { %s409_s1 = spop %408 }
 0x1e6   :  { %s411_s24 = spop %410  ;;  %v360_v12 = vstv %s409_s1 }
 0x1e7   :  { %v364_v29 = vstv %s411_s24  ;;  %v361_v30 = vsel %vm359_vm13, %v360_v12, 0.0 }
 0x1e8   :  { %v365_v31 = vsel %vm363_vm14, %v364_v29, 0.0 }
 0x1e9   :  { %v366_v33 = vadd.f32 %v365_v31, %v361_v30 }
 0x204   :  { %v327_v40 = vpop.xlane.xlu2 %326 }
 0x205   :  { %v328_v35 = vrot.slane %v327_v40, 4 }
 0x207   :  { %v329_v10 = vadd.f32 %v328_v35, %v327_v40 }
 0x209   :  { %v330_v48 = vrot.slane %v329_v10, 2 }
 0x20b   :  { %v331_v27 = vadd.f32 %v330_v48, %v329_v10 }
 0x20d   :  { %v332_v23 = vrot.slane %v331_v27, 1 }
 0x20f   :  { %v333_v25 = vadd.f32 %v332_v23, %v331_v27 }
 0x211   :  { %412 = vpush %v333_v25 }
 0x212   :  { %414 = vpush %v353_v26 }
 0x242   :  { %s413_s25 = spop %412 }
 0x243   :  { %v369_v54 = vstv %s413_s25  ;;  %s415_s26 = spop %414 }
 0x244   :  { %v370_v8 = vsel %vm368_vm0, %v369_v54, 0.0  ;;  %v374_v36 = vstv %s415_s26 }
 0x245   :  { %v371_v39 = vadd.f32 %v370_v8, %v366_v33  ;;  %v375_v41 = vsel %vm373_vm2, %v374_v36, 0.0 }
 0x247   :  { %v376_v42 = vadd.f32 %v375_v41, %v371_v39 }
 0x249   :  { %379 = vst [vmem:[#allocation2] sm:$0xff] %v376_v42 }
 0x24a   :  { %390 = dma.vmem_to_hbm [thread:$0]  %s386_s28, 128, %s388_s3, [#allocation3]  }
 0x24b   :  { %486 = dma.done.wait [#allocation3], 128  }
 0x24c   :  { %487 = vsyncadd [#allocation3], 4294967168 }
 0x24d   :  { %395 = vsyncpa [#allocation3], 1 }

</bundles_post_ra>
